<compile_context>
chip_gen: v7x
topology: tpu7x:2x2x1
jax: 0.10.0
libtpu: 0.0.40
codegen_flags: <defaults>
</compile_context>

<pallas_src>
import jax
import jax.numpy as jnp
from jax import lax
from jax.experimental import pallas as pl
from jax.experimental.pallas import tpu as pltpu

IN_FEATURES = 128
OUT_FEATURES = 10


def _linear_relu_kernel(x_ref, w_ref, b_ref, o_ref):
    # x_ref : (TB, 128)  VMEM  — one batch tile
    # w_ref : (10, 128)  VMEM  — torch (out_features, in_features) layout
    # b_ref : (1, 10)    VMEM
    # o_ref : (TB, 10)   VMEM
    # Contract x's feature dim with weight's in_features dim (no transpose op).
    y = lax.dot_general(
        x_ref[...], w_ref[...],
        dimension_numbers=(((1,), (1,)), ((), ())),
        preferred_element_type=jnp.float32,
    )                                       # (TB, 10)
    y = y + b_ref[...]                      # broadcast (1, 10) over batch tile
    o_ref[...] = jnp.maximum(y, 0.0).astype(o_ref.dtype)


def representation_forward(x, weight, bias, *, block_b=4096):
    """x: (B, 128) f32, weight: (10, 128) f32, bias: (10,) f32 -> (B, 10) f32.

    block_b: batch-tile size (rows per grid step). Must be a multiple of 8.
    """
    assert block_b % 8 == 0, "batch tile must be a multiple of 8 (sublane)"
    B = x.shape[0]
    b2 = bias.reshape(1, OUT_FEATURES)      # (1, 10)

    if B <= block_b:
        # Single block covering the whole (small) batch; block_shape equal to
        # the full array dims is always a legal layout.
        tb = B
    else:
        tb = block_b                        # remainder tile handled by Pallas

    grid = (pl.cdiv(B, tb),)

    out = pl.pallas_call(
        _linear_relu_kernel,
        out_shape=jax.ShapeDtypeStruct((B, OUT_FEATURES), jnp.float32),
        grid_spec=pltpu.PrefetchScalarGridSpec(
            num_scalar_prefetch=0,
            grid=grid,
            in_specs=[
                # x: streamed per batch tile (double-buffered by Pallas).
                pl.BlockSpec((tb, IN_FEATURES), lambda i: (i, 0)),
                # weight/bias: constant block index -> stay resident in VMEM.
                pl.BlockSpec((OUT_FEATURES, IN_FEATURES), lambda i: (0, 0)),
                pl.BlockSpec((1, OUT_FEATURES), lambda i: (0, 0)),
            ],
            out_specs=pl.BlockSpec((tb, OUT_FEATURES), lambda i: (i, 0)),
        ),
        compiler_params=pltpu.CompilerParams(
            # Batch tiles are independent -> shard across TCs on v7x megacore.
            dimension_semantics=("parallel",),
        ),
    )(x, weight, b2)
    return out


def _reference(x, weight, bias):
    return jnp.maximum(x @ weight.T + bias, 0.0)


if __name__ == "__main__":
    key = jax.random.PRNGKey(0)
    kx, kw, kb, kx2 = jax.random.split(key, 4)

    # Deterministic synthetic parameters (shapes from nn.Linear(128, 10)).
    bound = 1.0 / (IN_FEATURES ** 0.5)   # same scale as torch's default init
    weight = jax.random.uniform(
        kw, (OUT_FEATURES, IN_FEATURES), jnp.float32, -bound, bound)
    bias = jax.random.uniform(kb, (OUT_FEATURES,), jnp.float32, -bound, bound)

    # Case 1: multi-tile batch with a remainder (exercises tiling + masking).
    B1 = 24
    x1 = jax.random.normal(kx, (B1, IN_FEATURES), jnp.float32)
    out1 = jax.block_until_ready(representation_forward(x1, weight, bias,
                                                        block_b=16))
    ref1 = _reference(x1, weight, bias)
    assert out1.shape == (B1, OUT_FEATURES), out1.shape
    assert jnp.allclose(out1, ref1, atol=1e-5, rtol=1e-5), "mismatch (tiled)"

    # Case 2: small batch, single full block (default tile size).
    B2 = 8
    x2 = jax.random.normal(kx2, (B2, IN_FEATURES), jnp.float32)
    out2 = jax.block_until_ready(representation_forward(x2, weight, bias))
    ref2 = _reference(x2, weight, bias)
    assert out2.shape == (B2, OUT_FEATURES), out2.shape
    assert jnp.allclose(out2, ref2, atol=1e-5, rtol=1e-5), "mismatch (single)"

    print("KERNEL_OK")
</pallas_src>

<mosaic_0001>
module attributes {stable_mosaic.version = 11 : i64} {
  func.func @_linear_relu_kernel(%arg0: i32, %arg1: memref<16x128xf32, #tpu.memory_space<vmem>>, %arg2: memref<10x128xf32, #tpu.memory_space<vmem>>, %arg3: memref<1x10xf32, #tpu.memory_space<vmem>>, %arg4: memref<16x10xf32, #tpu.memory_space<vmem>>) attributes {dimension_semantics = [#tpu.dimension_semantics<parallel>], iteration_bounds = array<i64: 2>, scalar_prefetch = 0 : i64, scratch_operands = 0 : i64, tpu.core_type = #tpu.core_type<tc>, window_params = [{transform_indices = @transform_0, window_bounds = array<i64: 16, 128>}, {pipeline_mode = #tpu.pipeline_mode<synchronous>, transform_indices = @transform_1, window_bounds = array<i64: 10, 128>}, {pipeline_mode = #tpu.pipeline_mode<synchronous>, transform_indices = @transform_2, window_bounds = array<i64: 1, 10>}, {transform_indices = @transform_3, window_bounds = array<i64: 16, 10>}]} {
    %c0 = arith.constant 0 : index
    %c0_0 = arith.constant 0 : index
    %0 = vector.load %arg1[%c0, %c0_0] : memref<16x128xf32, #tpu.memory_space<vmem>>, vector<16x128xf32>
    %c0_1 = arith.constant 0 : index
    %c0_2 = arith.constant 0 : index
    %1 = vector.load %arg2[%c0_1, %c0_2] : memref<10x128xf32, #tpu.memory_space<vmem>>, vector<10x128xf32>
    %cst = arith.constant dense<0.000000e+00> : vector<16x10xf32>
    %2 = tpu.matmul %0, %1, %cst {dimension_numbers = #tpu.dot_dimension_numbers<[1], [1], [0], [0], [0, 0, 1, 0], [], []>} : vector<16x128xf32>, vector<10x128xf32>, vector<16x10xf32> -> vector<16x10xf32>
    %c0_3 = arith.constant 0 : index
    %c0_4 = arith.constant 0 : index
    %3 = vector.load %arg3[%c0_3, %c0_4] : memref<1x10xf32, #tpu.memory_space<vmem>>, vector<1x10xf32>
    %4 = vector.broadcast %3 : vector<1x10xf32> to vector<16x10xf32>
    %5 = arith.addf %2, %4 : vector<16x10xf32>
    %cst_5 = arith.constant 0.000000e+00 : f32
    %6 = vector.broadcast %cst_5 : f32 to vector<16x10xf32>
    %7 = arith.maximumf %5, %6 : vector<16x10xf32>
    %c0_6 = arith.constant 0 : index
    %c0_7 = arith.constant 0 : index
    %8 = vector.load %arg4[%c0_6, %c0_7] : memref<16x10xf32, #tpu.memory_space<vmem>>, vector<16x10xf32>
    tpu.vector_store %arg4[%c0_6, %c0_7], %7 {strides = array<i32>} : memref<16x10xf32, #tpu.memory_space<vmem>>, vector<16x10xf32>,
    return
  }
  func.func @transform_0(%arg0: i32) -> (i32, i32) {
    %c0_i32 = arith.constant 0 : i32
    %c0_i32_0 = arith.constant 0 : i32
    return %arg0, %c0_i32 : i32, i32
  }
  func.func @transform_1(%arg0: i32) -> (i32, i32) {
    %c0_i32 = arith.constant 0 : i32
    %c0_i32_0 = arith.constant 0 : i32
    %c0_i32_1 = arith.constant 0 : i32
    return %c0_i32, %c0_i32_0 : i32, i32
  }
  func.func @transform_2(%arg0: i32) -> (i32, i32) {
    %c0_i32 = arith.constant 0 : i32
    %c0_i32_0 = arith.constant 0 : i32
    %c0_i32_1 = arith.constant 0 : i32
    return %c0_i32, %c0_i32_0 : i32, i32
  }
  func.func @transform_3(%arg0: i32) -> (i32, i32) {
    %c0_i32 = arith.constant 0 : i32
    %c0_i32_0 = arith.constant 0 : i32
    return %arg0, %c0_i32 : i32, i32
  }
}

</mosaic_0001>

<bundles_post_ra>
// kernel: tpu_custom_call.1
= control target key start
LH: loop header
LB: loop body
LE: loop exit
PB: predicated region body
PF: predicated region fallthrough
CT: control target
= control target key end

     0   :  { %8 = vsyncpa [#allocation3], 0  ;;  %s1084_s0 = inlined_call_operand.hbm [shape: f32[24,128], index: 0, kind: input, shape index: {}]   ;;  %s1085_s1 = inlined_call_operand.hbm [shape: f32[10,128], index: 1, kind: input, shape index: {}]   ;;  %s1086_s2 = inlined_call_operand.vmem [shape: f32[1,10], index: 2, kind: input, shape index: {}]   ;;  %s1087_s3 = inlined_call_operand.vmem [shape: f32[24,10], index: 3, kind: output, shape index: {}]  }
   0x1   :  { %10 = vsyncpa [#allocation3 + $0x1], 0 }
   0x2   :  { %11 = vsyncpa [#allocation5], 0  ;;  %s897_s12 = smov 0   ;;  %s899_s13 = smov 0  }
   0x3   :  { %s901_s14 = smov 0   ;;  %s903_s15 = smov 0  }
   0x4 LB: > { %s916_s16 = sadd.s32 4294967295, %s837_s15   ;;  %s919_s17 = sadd.s32 1, %s837_s15   ;;  %s837_s15 = sphi %s903_s15, %s1105_s15   ;;  %s833_s14 = sphi %s901_s14, %s1104_s14   ;;  %s829_s13 = sphi %s899_s13, %s1103_s13   ;;  %s825_s12 = sphi %s897_s12, %s1102_s12  }
   0x5   : > { %s21_s18 = ssub.s32 %s837_s15, %s919_s17  ;;  %s24_s19 = sadd.s32 1, %s833_s14 }
   0x6   : > { %p22_p0 = scmp.eq.s32.totalorder %s21_s18, 0  ;;  %p31_p1 = scmp.ne.s32.totalorder %s833_s14, %s829_s13 }
   0x7   : > { %p32_p2 = scmp.eq.s32.totalorder %s837_s15, 0  ;;  %p37_p3 = scmp.ne.s32.totalorder %s829_s13, %s825_s12 }
   0x8   : > { %s929_s20 = scalar_select %p22_p0, %s833_s14, %s24_s19  }
   0x9   : > { %p931_p4 = por %p32_p2, %p31_p1  ;;  %p1088_p5 = scmp.eq.s32.totalorder %s916_s16, 0 }
   0xa   : > { %p103_p6 = scmp.eq.s32.totalorder %s916_s16, 1  ;;  %p548_p7 = scmp.ge.s32.totalorder %s837_s15, 1 }
   0xb   : > { %s1091_s21 = scalar_select %p931_p4, 1, 0 }
   0xc   : > { %p940_p8 = por %p1088_p5, %p37_p3  ;;  %p116_p9 = scmp.lt.s32.totalorder %s837_s15, 3 }
   0xd   : > { %p945_p10 = por %p103_p6, %p31_p1  ;;  %s871_s25 = smov [#allocation4]  }
   0xe   : > { %s1092_s22 = scalar_select %p940_p8, 1, 0 }
   0xf   : > { %s1093_s23 = scalar_select %p945_p10, 1, 0 }
  0x10   : > { %p949_p11 = pnand %p548_p7, %p116_p9  ;;  %s128_s26 = sshll.u32 %s871_s25, 4  ;;  %s129_s26 = int_to_ptr.vmem [resolvable:$true] %s128_s26 }
  0x11   : > { %s711_s30 = scalar_lea.hbm %s1085_s1, 256 }
  0x12   : > { %s1094_s24 = scalar_select %p949_p11, 1, 0 }
  0x13   : > { %p604_p12 = pneg %p949_p11  ;;  %p712_p0 = scmp.ne.s32.totalorder %s1085_s1, %s711_s30 }
  0x14   : > { %p718_p6 = scmp.lt.u32.totalorder %s711_s30, %s1085_s1 }
  0x15   : > { %p957_p13 = pnand %p604_p12, %p1088_p5 }
  0x17   : > { %p713_p1 = pneg %p957_p13 }
  0x19   : > { %p714_p2 = pnand %p713_p1, %p712_p0 }
  0x1b   : > { %p715_p3 = pneg %p714_p2 }
  0x1d   : > { %p720_p7 = pnand %p718_p6, %p715_p3 }
  0x1f   : > { %723 = shalt.err (!%p720_p7)
}
  0x20   : > { %s724_s8 = scalar_lea.vmem %s129_s26, 256  ;;  %p732_p10 = scmp.lt.s32.totalorder %s129_s26, %s129_s26 }
  0x21   : > { %p725_p9 = scmp.ne.s32.totalorder %s129_s26, %s724_s8  ;;  %p733_p8 = scmp.lt.s32.totalorder %s724_s8, %s724_s8 }
  0x23   : > { %p727_p12 = pnand %p725_p9, %p713_p1  ;;  %p734_p11 = por %p733_p8, %p732_p10 }
  0x25   : > { %p728_p5 = pneg %p727_p12 }
  0x27   : > { %p735_p4 = pnand %p734_p11, %p728_p5 }
  0x29   : > { %738 = shalt.err (!%p735_p4)
}
  0x2a   : > { %s872_s9 = smov 128   ;;  %s873_s10 = smov 8  }
  0x2b   : > { %607 = dma.hbm_to_vmem [thread:$0]  (!%p957_p13), %s1085_s1, 256, %s129_s26, [#allocation5], %s872_s9, %s872_s9, %s873_s10  }
  0x2c   : > { %p550_p0 = scmp.ge.s32.totalorder %s837_s15, 2 }
  0x2d   : > { %p1096_p2 = scmp.ne.s32.totalorder (!%p550_p0), %s1091_s21, 0 }
  0x2e   : > { %141 = sbr.rel (%p550_p0) target bundleno = 88 (0x58), region = 24 }
  0x35   : > { %144 = sbr.rel (!%p1096_p2) target bundleno = 88 (0x58), region = 28  ;;  %s145_s18 = sand.u32 (%p1096_p2), 1, %s833_s14  }
  0x36   : > { %s552_s19 = sshll.u32 (%p1096_p2), %s837_s15, 1  ;;  %s551_s25 = sshll.u32 (%p1096_p2), %s145_s18, 4 }
  0x37   : > { %s151_s28 = ssub.s32 (%p1096_p2), 3, %s552_s19  ;;  %s985_s30 = scalar_lea.sflag (%p1096_p2), [#allocation3], %s145_s18 }
  0x38   : > { %p152_p4 = scmp.lt.s32.totalorder (%p1096_p2), %s151_s28, 2  ;;  %s149_s26 = scalar_lea.vmem (%p1096_p2), [#allocation2], %s551_s25 }
  0x3c   : > { %s1107_s28 = smov (!%p152_p4, %s151_s28), 2 }
  0x3d   : > { %s982_s29 = sshll.u32 %s1107_s28, 7 }
  0x3e   : > { %s156_s27 = ssub.s32 256, %s982_s29 }
  0x3f   : > { %157 = vsyncadd %s985_s30, %s156_s27  ;;  %p554_p5 = scmp.ne.s32.totalorder %s982_s29, 0  ;;  %s580_s21 = sshll.u32 %s837_s15, 8 }
  0x40   : > { %s993_s6 = scalar_lea.hbm %s1084_s0, %s580_s21  ;;  %s162_s7 = sshll.u32 %s149_s26, 4  ;;  %s995_s7 = int_to_ptr.vmem [resolvable:$true] %s162_s7 }
  0x41   : > { %s739_s8 = scalar_lea.hbm %s993_s6, %s982_s29  ;;  %s743_s15 = scalar_lea.hbm %s1084_s0, 384 }
  0x42   : > { %p740_p8 = scmp.ne.s32.totalorder %s993_s6, %s739_s8  ;;  %p744_p13 = scmp.lt.u32.totalorder %s993_s6, %s1084_s0 }
  0x43   : > { %p745_p1 = scmp.lt.u32.totalorder %s743_s15, %s739_s8  ;;  %p747_p6 = scmp.lt.u32.totalorder %s739_s8, %s993_s6 }
  0x44   : > { %p741_p10 = pnand %p740_p8, %p554_p5 }
  0x45   : > { %p746_p3 = por %p745_p1, %p744_p13 }
  0x46   : > { %p742_p11 = pneg %p741_p10 }
  0x47   : > { %p748_p7 = por %p747_p6, %p746_p3 }
  0x49   : > { %p749_p9 = pnand %p748_p7, %p742_p11 }
  0x4b   : > { %752 = shalt.err (!%p749_p9)
}
  0x4c   : > { %s753_s18 = scalar_lea.vmem %s995_s7, %s982_s29  ;;  %s874_s19 = smov [#allocation2]  }
  0x4d   : > { %p754_p12 = scmp.ne.s32.totalorder %s995_s7, %s753_s18  ;;  %s757_s25 = sshll.u32 %s874_s19, 4  ;;  %s758_s25 = int_to_ptr.vmem [resolvable:$false] %s757_s25 }
  0x4e   : > { %s759_s28 = scalar_lea.vmem %s758_s25, 512  ;;  %p760_p4 = scmp.lt.s32.totalorder %s995_s7, %s758_s25 }
  0x4f   : > { %p755_p0 = pnand %p754_p12, %p554_p5  ;;  %p761_p8 = scmp.lt.s32.totalorder %s759_s28, %s753_s18 }
  0x51   : > { %p756_p2 = pneg %p755_p0  ;;  %p762_p10 = por %p761_p8, %p760_p4 }
  0x53   : > { %p763_p13 = pnand %p762_p10, %p756_p2 }
  0x55   : > { %766 = shalt.err (!%p763_p13)
}
  0x56   : > { %s875_s27 = smov 128   ;;  %s876_s26 = smov 8  }
  0x57   : > { %168 = dma.hbm_to_vmem [thread:$0]  (%p554_p5), %s993_s6, %s982_s29, %s995_s7, %s985_s30, %s875_s27, %s875_s27, %s876_s26  }
  0x58 PF: > { %p1097_p11 = scmp.ne.s32.totalorder %s1094_s24, 0 }
  0x59   : > { %s176_s21 = sand.u32 (!%p1097_p11), 1, %s829_s13   ;;  %p1098_p1 = scmp.ne.s32.totalorder (!%p1097_p11), %s1092_s22, 0 }
  0x5a   : > { %174 = sbr.rel (%p1097_p11) target bundleno = 379 (0x17b), region = 32  ;;  %s559_s4 = sshll.u32 (!%p1097_p11), %s176_s21, 4 }
  0x5b   : > { %s177_s5 = scalar_lea.sflag (!%p1097_p11), [#allocation3], %s176_s21  ;;  %s180_s8 = scalar_lea.vmem (!%p1097_p11), [#allocation2], %s559_s4 }
  0x61   : > { %816 = dma.done.wait (%p1098_p1), %s177_s5, 256  }
  0x62   : > { %818 = vsyncadd (%p1098_p1), %s177_s5, 4294967040  ;;  %p1099_p3 = scmp.eq.s32.totalorder %s916_s16, 0 }
  0x64   : > { %820 = dma.done.wait (%p1099_p3), [#allocation5], 256   ;;  %p1100_p5 = pmov %p1099_p3 }
  0x65   : > { %v218_v0 = vld [vmem:[#allocation4] sm:$0xff]  ;;  %v219_v1 = vld [vmem:[#allocation4 + $0x8] sm:$0x3]  ;;  %vm304_vm0 = vcmask 80896   ;;  %s1036_s22 = scalar_lea.vmem [#allocation6], %s559_s4   ;;  %p1101_p6 = scmp.ne.s32.totalorder %s1093_s23, 0 }
  0x66   : > { %822 = vsyncadd (%p1100_p5), [#allocation5], 4294967040  ;;  %v216_v2 = vld [vmem:[%s180_s8] sm:$0xff]  ;;  %v595_v3 = vpack.c.bf16 %v219_v1, %v218_v0  ;;  %v217_v4 = vld [vmem:[%s180_s8 + $0x8] sm:$0xff]  ;;  %s564_s30 = sshll.u32 (%p1101_p6), %s916_s16, 1  ;;  %s581_s6 = sshll.u32 (%p1101_p6), %s916_s16, 4 }
  0x67   : > { %592 = vmatprep.mubr.f32.mxu0 %v216_v2  ;;  %v562_v5 = vld [vmem:[%s1086_s2] ss:$0 sm:$0xff]  ;;  %s315_s7 = ssub.s32 (%p1101_p6), 3, %s564_s30  ;;  %s1047_s15 = scalar_lea.vmem (%p1101_p6), %s1087_s3, %s581_s6  }
  0x68   : > { %596 = vmatprep.subr.bf16.mxu0 %v595_v3  ;;  %p316_p7 = scmp.lt.s32.totalorder (%p1101_p6), %s315_s7, 2 }
  0x69   : > { %598 = vmatpush3.bf16.xpose.msra.mxu0 %v595_v3 }
  0x70   : > { %593 = vmatmul.mubr.f32.vlgmr.msra.gmra.mrb[0].mxu0 %v217_v4 }
 0x143   : > { %v594_v6 = vpop.f32.mrb[0].mxu0  ;;  %313 = sbr.rel (!%p1101_p6) target bundleno = 379 (0x17b), region = 44 }
 0x144   : > { %v299_v7 = vadd.f32 %v594_v6, %v562_v5  ;;  %v293_v8 = vpop.f32.mrb[1].mxu0 }
 0x145   : > { %v294_v9 = vadd.f32 %v562_v5, %v293_v8 }
 0x146   : > { %v303_v10 = vmax.f32 %v299_v7, 0.0 }
 0x147   : > { %v302_v11 = vmax.f32 %v294_v9, 0.0 }
 0x148   : > { %306 = vst.msk [vmem:[%s1036_s22 + $0x8] sm:$0xff] %vm304_vm0, %v303_v10 }
 0x149   : > { %305 = vst.msk [vmem:[%s1036_s22] sm:$0xff] %vm304_vm0, %v302_v11 }
 0x14a   : > { %s1109_s7 = smov (!%p316_p7, %s315_s7), 2 }
 0x14b   : > { %s565_s11 = sshll.u32 %s1109_s7, 7 }
 0x14c   : > { %p568_p9 = scmp.eq.s32.totalorder %s565_s11, 0 }
 0x14d   : > { %s1053_s23 = sshrl.u32 (!%p568_p9), %s1109_s7, 1 }
 0x14e   : > { %324 = sbr.rel (%p568_p9) target bundleno = 379 (0x17b), region = 48  ;;  %p569_p12 = scmp.le.s32.totalorder (!%p568_p9), %s1053_s23, 0 }
 0x155   : > { %491 = sbr.rel (%p569_p12) target bundleno = 358 (0x166), region = 130  ;;  %s839_s16 = smov (!%p569_p12), %s1047_s15  }
 0x156   : > { %s843_s12 = smov (!%p569_p12), %s1036_s22   ;;  %s847_s18 = smov (!%p569_p12), 0  }
 0x157   : > { %s851_s19 = smov (!%p569_p12), 0  }
 0x15c LB: >> { %v388_v12 = vld [vmem:[%s845_s12] sm:$0xff]  ;;  %v390_v13 = vld [vmem:[%s845_s12 + $0x8] sm:$0xff]  ;;  %s392_s25 = sadd.s32 1, %s849_s18  ;;  %s382_s19 = sadd.s32 1, %s853_s19   ;;  %s853_s19 = sphi %s851_s19, %s382_s19   ;;  %s849_s18 = sphi %s847_s18, %s848_s18   ;;  %s845_s12 = sphi %s843_s12, %s397_s12   ;;  %s841_s16 = sphi %s839_s16, %s398_s16  }
 0x15d   : >> { %389 = vst [vmem:[%s841_s16] sm:$0xff] %v388_v12  ;;  %391 = vst [vmem:[%s841_s16 + $0x8] sm:$0xff] %v390_v13  ;;  %p393_p0 = scmp.ge.s32.totalorder %s392_s25, %s1053_s23  ;;  %p381_p2 = scmp.ge.s32.totalorder %s382_s19, %s1053_s23 }
 0x15f   : >> { %s1111_s25 = smov (%p393_p0, %s392_s25), 0  ;;  %384 = sbr.rel (!%p381_p2) target bundleno = 348 (0x15c), region = 136 }
 0x160   : >> { %s570_s28 = sshll.u32 %s1111_s25, 4  ;;  %s848_s18 = smov %s1111_s25  }
 0x161   : >> { %s397_s12 = scalar_lea.vmem %s1036_s22, %s570_s28 [#allocation6]   ;;  %s398_s16 = scalar_lea.vmem %s1047_s15, %s570_s28  }
 0x166 PF: > { %s1063_s27 = sand.u32 1, %s1109_s7   ;;  %s582_s26 = sshll.u32 %s1053_s23, 4 }
 0x167   : > { %s403_s21 = scalar_lea.vmem %s1036_s22, %s582_s26 [#allocation6]   ;;  %s405_s4 = scalar_lea.vmem %s1047_s15, %s582_s26  }
 0x168   : > { %p575_p4 = scmp.le.s32.totalorder %s1063_s27, 0 }
 0x169   : > { %s855_s5 = smov (!%p575_p4), %s405_s4   ;;  %s859_s8 = smov (!%p575_p4), %s403_s21  }
 0x16a   : > { %505 = sbr.rel (%p575_p4) target bundleno = 379 (0x17b), region = 141  ;;  %s863_s24 = smov (!%p575_p4), 0  }
 0x16b   : > { %s867_s29 = smov (!%p575_p4), 0  }
 0x171 LB: >> { %v415_v14 = vld [vmem:[%s861_s8] sm:$0xff]  ;;  %s417_s30 = sadd.s32 1, %s865_s24  ;;  %s409_s29 = sadd.s32 1, %s869_s29   ;;  %s869_s29 = sphi %s867_s29, %s409_s29   ;;  %s865_s24 = sphi %s863_s24, %s864_s24   ;;  %s861_s8 = sphi %s859_s8, %s422_s8   ;;  %s857_s5 = sphi %s855_s5, %s423_s5  }
 0x172   : >> { %416 = vst [vmem:[%s857_s5] sm:$0xff] %v415_v14  ;;  %p418_p8 = scmp.ge.s32.totalorder %s417_s30, %s1063_s27  ;;  %p408_p10 = scmp.ge.s32.totalorder %s409_s29, %s1063_s27 }
 0x174   : >> { %s1113_s30 = smov (%p418_p8, %s417_s30), 0  ;;  %411 = sbr.rel (!%p408_p10) target bundleno = 369 (0x171), region = 147 }
 0x175   : >> { %s576_s22 = sshll.u32 %s1113_s30, 3  ;;  %s864_s24 = smov %s1113_s30  }
 0x176   : >> { %s422_s8 = scalar_lea.vmem %s403_s21, %s576_s22 [#allocation6]   ;;  %s423_s5 = scalar_lea.vmem %s405_s4, %s576_s22  }
 0x17b PF: > { %p14_p13 = scmp.ge.s32.totalorder %s919_s17, 4   ;;  %s1102_s12 = smov %s829_s13 }
 0x17c   : > { %s1103_s13 = smov %s833_s14  ;;  %s1104_s14 = smov %s929_s20 }
 0x17d   : > { %s1105_s15 = smov %s919_s17  ;;  %16 = sbr.rel (!%p14_p13) target bundleno = 4 (0x4), region = 158 }
 0x184   :  { %439 = vsyncpa [#allocation3], 1 }
 0x185   :  { %441 = vsyncpa [#allocation3 + $0x1], 1 }
 0x186   :  { %442 = vsyncpa [#allocation5], 1 }

</bundles_post_ra>
